<compile_context>
chip_gen: v6e
topology: v6e:2x2x1
jax: 0.10.0
libtpu: 0.0.40
codegen_flags: <defaults>
</compile_context>

<pallas_src>
import functools

import jax
import jax.numpy as jnp
from jax.experimental import pallas as pl
from jax.experimental.pallas import tpu as pltpu

EPS = 1e-5  # BatchNorm2d default eps


# ----------------------------------------------------------------------------
# Fused kernel: gcn + BN1 + ReLU + temporal conv + BN2 + residual + ReLU
# ----------------------------------------------------------------------------
def _stgcn_kernel(kt, pad, Tt, T, VC,
                  xw_ref, wgr_ref, bgr_ref, wt_ref, sh_ref, o_ref):
    # xw_ref : (1, 1, Tw, Din)   x window with (kt-1)-row temporal halo
    # wgr_ref: (Din, 2*VC)       [folded gcn | folded residual] weights
    # bgr_ref: (1, 2*VC)         matching biases (BN shifts folded)
    # wt_ref : (kt, VC, VC)      temporal taps, block-diag, BN2-scale folded
    # sh_ref : (1, VC)           BN2 shift (+ conv bias bt)
    # o_ref  : (1, Tt, VC)
    xw = xw_ref[0, 0]                                            # (Tw, Din)

    # One MXU pass feeds BOTH branches (concatenated RHS).
    gr = jnp.dot(xw, wgr_ref[...],
                 preferred_element_type=jnp.float32) + bgr_ref[...]
    hw = jnp.maximum(gr[:, :VC], 0.0)                            # BN1 + ReLU

    # The temporal conv zero-pads h; halo rows outside [0, T) must be 0
    # (relu(bg) != 0), so mask by global h index.
    row = jax.lax.broadcasted_iota(jnp.int32, (Tt + kt - 1, 1), 0)
    g = pl.program_id(1) * Tt + row - pad
    hw = jnp.where((g >= 0) & (g < T), hw, 0.0)

    res = gr[pad:pad + Tt, VC:]                                  # BN_r folded

    # Temporal taps (kt small & static). dt>0 slices start sublane-unaligned;
    # the relayout is tiny here and hidden under the matmuls.
    acc = jnp.dot(hw[0:Tt], wt_ref[0], preferred_element_type=jnp.float32)
    for dt in range(1, kt):
        acc = acc + jnp.dot(hw[dt:dt + Tt], wt_ref[dt],
                            preferred_element_type=jnp.float32)

    y = acc + sh_ref[...] + res                                  # BN2 + skip
    o_ref[0] = jnp.maximum(y, 0.0).astype(o_ref.dtype)


def st_gcn_fused(xwin, wgr, bgr, wt_s, sh2, N, T, Tt, kt, pad, VC):
    nT = xwin.shape[1]
    Tw = Tt + kt - 1
    Din = xwin.shape[-1]
    kern = functools.partial(_stgcn_kernel, kt, pad, Tt, T, VC)

    # VMEM budget derived from the actual block footprint (double-buffered),
    # clamped to what every TPU generation physically has.
    blk_bytes = 4 * (Tw * Din + Din * 2 * VC + 2 * VC
                     + kt * VC * VC + VC + Tt * VC)
    vmem_cap = int(min(max(2.5 * blk_bytes + (4 << 20), 16 << 20), 64 << 20))

    return pl.pallas_call(
        kern,
        out_shape=jax.ShapeDtypeStruct((N, T, VC), jnp.float32),
        grid=(N, nT),
        in_specs=[
            pl.BlockSpec((1, 1, Tw, Din), lambda n, i: (n, i, 0, 0)),  # xwin
            pl.BlockSpec((Din, 2 * VC), lambda n, i: (0, 0)),          # Wgr
            pl.BlockSpec((1, 2 * VC), lambda n, i: (0, 0)),            # bgr
            pl.BlockSpec((kt, VC, VC), lambda n, i: (0, 0, 0)),        # Wt
            pl.BlockSpec((1, VC), lambda n, i: (0, 0)),                # shift2
        ],
        out_specs=pl.BlockSpec((1, Tt, VC), lambda n, i: (n, i, 0)),
        compiler_params=pltpu.CompilerParams(
            dimension_semantics=("parallel", "parallel"),
            vmem_limit_bytes=vmem_cap),
    )(xwin, wgr, bgr, wt_s, sh2)


# ----------------------------------------------------------------------------
# st_gcn forward (Pallas path)
# ----------------------------------------------------------------------------
def st_gcn_forward(x, A, p):
    """x: (N, Cin, T, V) f32, A: (K, V, V) f32. Returns (out NCHW, A)."""
    N, Cin, T, V = x.shape
    K = A.shape[0]
    C = p["bg"].shape[0] // K
    kt = p["Wt"].shape[2]
    pad = (kt - 1) // 2
    VC = V * C
    Din = V * Cin
    hi = jax.lax.Precision.HIGHEST
    # TODO(synk): temporal stride > 1 / residual=False / identity-residual
    # variants not specialized (module defaults: stride=1, residual=True,
    # in_channels != out_channels -> conv1x1 + BN residual, as here).

    # -------- eval-mode BN folding (plain JAX, once per call) ---------------
    scale_r = p["gamma_r"] / jnp.sqrt(p["var_r"] + EPS)
    shift_r = p["beta_r"] - p["mean_r"] * scale_r
    scale1 = p["gamma1"] / jnp.sqrt(p["var1"] + EPS)
    shift1 = p["beta1"] - p["mean1"] * scale1
    scale2 = p["gamma2"] / jnp.sqrt(p["var2"] + EPS)
    shift2 = p["beta2"] - p["mean2"] * scale2

    # gcn branch folded to one per-frame linear map (V*Cin) -> (V*C):
    #   Mg[(v,ci),(w,c)] = scale1[c] * sum_k A[k,v,w] * Wg[k*C+c, ci]
    Wg3 = p["Wg"].reshape(K, C, Cin)
    Mg = jnp.einsum("kvw,kci->viwc", A, Wg3,
                    precision=hi) * scale1[None, None, None, :]
    Wg_full = Mg.reshape(Din, VC)
    Asum = A.sum(axis=1)                                   # sum_v A[k,v,w]
    bg_full = (jnp.einsum("kw,kc->wc", Asum, p["bg"].reshape(K, C),
                          precision=hi) * scale1[None, :]
               + shift1[None, :]).reshape(VC)

    # residual branch (conv1x1 + BN_r), block-diagonal over nodes so it shares
    # the same lane-dense x block inside the kernel (exact 0/1 placement).
    Wr_eff = p["Wr"].T * scale_r[None, :]                  # (Cin, Cout)
    br_eff = p["br"] * scale_r + shift_r
    eyeV = jnp.eye(V, dtype=jnp.float32)
    Wr_full = (eyeV[:, None, :, None]
               * Wr_eff[None, :, None, :]).reshape(Din, VC)
    br_full = jnp.tile(br_eff, V)

    # Single concatenated RHS: one MXU pass feeds both branches.
    Wgr = jnp.concatenate([Wg_full, Wr_full], axis=1)      # (Din, 2*VC)
    bgr = jnp.concatenate([bg_full, br_full]).reshape(1, 2 * VC)

    # Temporal-conv weights, block-diagonal over nodes, BN2 scale folded into
    # columns; conv bias bt folded into the BN2 shift.
    wt = jnp.transpose(p["Wt"], (2, 1, 0))                 # (kt, Cin=C, Cout=C)
    wt_blk = (eyeV[None, :, None, :, None]
              * wt[:, None, :, None, :]).reshape(kt, VC, VC)
    wt_s = wt_blk * jnp.tile(scale2, V)[None, None, :]
    sh2 = jnp.tile(scale2 * p["bt"] + shift2, V).reshape(1, VC)

    # -------- overlapping temporal x windows (halo materialized once) -------
    Tt = T if T <= 512 else 512                            # budget-driven tile
    nT = pl.cdiv(T, Tt)
    Tw = Tt + kt - 1
    Tpad = nT * Tt + (kt - 1)
    x_t = jnp.transpose(x, (0, 2, 3, 1)).reshape(N, T, Din)
    x_pad = jnp.pad(x_t, ((0, 0), (pad, Tpad - T - pad), (0, 0)))
    xwin = jnp.stack([x_pad[:, i * Tt:i * Tt + Tw] for i in range(nT)],
                     axis=1)                               # (N, nT, Tw, Din)

    out3 = st_gcn_fused(xwin, Wgr, bgr, wt_s, sh2, N, T, Tt, kt, pad, VC)
    out = jnp.transpose(out3.reshape(N, T, V, C), (0, 3, 1, 2))
    return out, A


# ----------------------------------------------------------------------------
# Pure-JAX reference (mirrors the PyTorch module, eval mode)
# ----------------------------------------------------------------------------
def _bn_nchw(x, gamma, beta, mean, var):
    return ((x - mean[None, :, None, None])
            / jnp.sqrt(var[None, :, None, None] + EPS)
            * gamma[None, :, None, None] + beta[None, :, None, None])


def st_gcn_ref(x, A, p):
    N, Cin, T, V = x.shape
    K = A.shape[0]
    Cout = p["bg"].shape[0] // K
    kt = p["Wt"].shape[2]
    pad = (kt - 1) // 2
    res = jnp.einsum("oc,nctv->notv", p["Wr"], x) + p["br"][None, :, None, None]
    res = _bn_nchw(res, p["gamma_r"], p["beta_r"], p["mean_r"], p["var_r"])
    y = jnp.einsum("oc,nctv->notv", p["Wg"], x) + p["bg"][None, :, None, None]
    y = y.reshape(N, K, Cout, T, V)
    g = jnp.einsum("nkctv,kvw->nctw", y, A)
    h = jnp.maximum(_bn_nchw(g, p["gamma1"], p["beta1"], p["mean1"], p["var1"]),
                    0.0)
    hp = jnp.pad(h, ((0, 0), (0, 0), (pad, pad), (0, 0)))
    out = sum(jnp.einsum("oc,nctv->notv", p["Wt"][:, :, dt],
                         hp[:, :, dt:dt + T, :]) for dt in range(kt))
    out = out + p["bt"][None, :, None, None]
    out = _bn_nchw(out, p["gamma2"], p["beta2"], p["mean2"], p["var2"])
    return jnp.maximum(out + res, 0.0), A


# ----------------------------------------------------------------------------
# Deterministic parameter construction + demo
# ----------------------------------------------------------------------------
def make_params(key, cin, cout, K, kt):
    ks = jax.random.split(key, 16)
    n = lambda k, s, sc=0.1: sc * jax.random.normal(k, s, jnp.float32)

    def bn(k):
        a, b, c, d = jax.random.split(k, 4)
        return (1.0 + n(a, (cout,)),            # gamma
                n(b, (cout,)),                  # beta
                n(c, (cout,)),                  # running_mean
                1.0 + jnp.abs(n(d, (cout,))))   # running_var

    g1 = bn(ks[0]); g2 = bn(ks[1]); gr = bn(ks[2])
    return dict(
        Wg=n(ks[3], (K * cout, cin), 0.3), bg=n(ks[4], (K * cout,)),
        Wt=n(ks[5], (cout, cout, kt), 0.3), bt=n(ks[6], (cout,)),
        Wr=n(ks[7], (cout, cin), 0.3), br=n(ks[8], (cout,)),
        gamma1=g1[0], beta1=g1[1], mean1=g1[2], var1=g1[3],
        gamma2=g2[0], beta2=g2[1], mean2=g2[2], var2=g2[3],
        gamma_r=gr[0], beta_r=gr[1], mean_r=gr[2], var_r=gr[3],
    )


if __name__ == "__main__":
    # N=2, in_channels=4, out_channels=8, T=16, V=16,
    # kernel_size=(3, 3) -> temporal kt=3, spatial K=3, stride=1, dropout=0.
    N, Cin, Cout, T, V, K, kt = 2, 4, 8, 16, 16, 3, 3

    key = jax.random.PRNGKey(0)
    kx, ka, kp = jax.random.split(key, 3)
    x = jax.random.normal(kx, (N, Cin, T, V), jnp.float32)
    A = jax.nn.softmax(jax.random.normal(ka, (K, V, V), jnp.float32), axis=-1)
    params = make_params(kp, Cin, Cout, K, kt)

    out, A_out = jax.jit(st_gcn_forward)(x, A, params)
    out = jax.block_until_ready(out)

    ref, _ = st_gcn_ref(x, A, params)
    assert out.shape == (N, Cout, T, V)
    err = float(jnp.max(jnp.abs(out - ref)))
    assert jnp.allclose(out, ref, atol=5e-4, rtol=5e-4), err
    assert jnp.allclose(A_out, A)

    print("KERNEL_OK")
</pallas_src>

<mosaic_0001>
module attributes {stable_mosaic.version = 11 : i64} {
  func.func @_stgcn_kernel(%arg0: i32, %arg1: i32, %arg2: memref<1x1x18x64xf32, #tpu.memory_space<vmem>>, %arg3: memref<64x256xf32, #tpu.memory_space<vmem>>, %arg4: memref<1x256xf32, #tpu.memory_space<vmem>>, %arg5: memref<3x128x128xf32, #tpu.memory_space<vmem>>, %arg6: memref<1x128xf32, #tpu.memory_space<vmem>>, %arg7: memref<1x16x128xf32, #tpu.memory_space<vmem>>) attributes {dimension_semantics = [#tpu.dimension_semantics<parallel>, #tpu.dimension_semantics<parallel>], iteration_bounds = array<i64: 2, 1>, scalar_prefetch = 0 : i64, scratch_operands = 0 : i64, tpu.core_type = #tpu.core_type<tc>, window_params = [{transform_indices = @transform_0, window_bounds = array<i64: 1, 1, 18, 64>}, {pipeline_mode = #tpu.pipeline_mode<synchronous>, transform_indices = @transform_1, window_bounds = array<i64: 64, 256>}, {pipeline_mode = #tpu.pipeline_mode<synchronous>, transform_indices = @transform_2, window_bounds = array<i64: 1, 256>}, {pipeline_mode = #tpu.pipeline_mode<synchronous>, transform_indices = @transform_3, window_bounds = array<i64: 3, 128, 128>}, {pipeline_mode = #tpu.pipeline_mode<synchronous>, transform_indices = @transform_4, window_bounds = array<i64: 1, 128>}, {transform_indices = @transform_5, window_bounds = array<i64: 1, 16, 128>}]} {
    %c0 = arith.constant 0 : index
    %c0_0 = arith.constant 0 : index
    %c0_1 = arith.constant 0 : index
    %c0_2 = arith.constant 0 : index
    %0 = vector.load %arg2[%c0, %c0_0, %c0_1, %c0_2] : memref<1x1x18x64xf32, #tpu.memory_space<vmem>>, vector<1x1x18x64xf32>
    %1 = vector.shape_cast %0 : vector<1x1x18x64xf32> to vector<18x64xf32>
    %c0_3 = arith.constant 0 : index
    %c0_4 = arith.constant 0 : index
    %2 = vector.load %arg3[%c0_3, %c0_4] : memref<64x256xf32, #tpu.memory_space<vmem>>, vector<64x256xf32>
    %cst = arith.constant dense<0.000000e+00> : vector<18x256xf32>
    %3 = tpu.matmul %1, %2, %cst {dimension_numbers = #tpu.dot_dimension_numbers<[1], [0], [0], [1], [0, 0, 1, 1], [], []>} : vector<18x64xf32>, vector<64x256xf32>, vector<18x256xf32> -> vector<18x256xf32>
    %c0_5 = arith.constant 0 : index
    %c0_6 = arith.constant 0 : index
    %4 = vector.load %arg4[%c0_5, %c0_6] : memref<1x256xf32, #tpu.memory_space<vmem>>, vector<1x256xf32>
    %5 = vector.broadcast %4 : vector<1x256xf32> to vector<18x256xf32>
    %6 = arith.addf %3, %5 : vector<18x256xf32>
    %7 = vector.extract_strided_slice %6 {offsets = [0, 0], sizes = [18, 128], strides = [1, 1]} : vector<18x256xf32> to vector<18x128xf32>
    %cst_7 = arith.constant 0.000000e+00 : f32
    %8 = vector.broadcast %cst_7 : f32 to vector<18x128xf32>
    %9 = arith.maximumf %7, %8 : vector<18x128xf32>
    %10 = tpu.iota {dimensions = array<i32: 0>} : vector<18x1xi32>
    %c16_i32 = arith.constant 16 : i32
    %11 = arith.muli %arg1, %c16_i32 : i32
    %12 = vector.broadcast %11 : i32 to vector<18x1xi32>
    %13 = arith.addi %12, %10 : vector<18x1xi32>
    %c1_i32 = arith.constant 1 : i32
    %14 = vector.broadcast %c1_i32 : i32 to vector<18x1xi32>
    %15 = arith.subi %13, %14 : vector<18x1xi32>
    %c0_i32 = arith.constant 0 : i32
    %16 = vector.broadcast %c0_i32 : i32 to vector<18x1xi32>
    %17 = arith.cmpi sge, %15, %16 : vector<18x1xi32>
    %c16_i32_8 = arith.constant 16 : i32
    %18 = vector.broadcast %c16_i32_8 : i32 to vector<18x1xi32>
    %19 = arith.cmpi slt, %15, %18 : vector<18x1xi32>
    %20 = arith.andi %17, %19 : vector<18x1xi1>
    %cst_9 = arith.constant 0.000000e+00 : f32
    %21 = vector.shape_cast %20 : vector<18x1xi1> to vector<18x1xi1>
    %22 = vector.broadcast %21 : vector<18x1xi1> to vector<18x128xi1>
    %23 = vector.broadcast %cst_9 : f32 to vector<18x128xf32>
    %24 = arith.select %22, %9, %23 : vector<18x128xi1>, vector<18x128xf32>
    %25 = vector.extract_strided_slice %6 {offsets = [1, 128], sizes = [16, 128], strides = [1, 1]} : vector<18x256xf32> to vector<16x128xf32>
    %26 = vector.extract_strided_slice %24 {offsets = [0, 0], sizes = [16, 128], strides = [1, 1]} : vector<18x128xf32> to vector<16x128xf32>
    %c0_10 = arith.constant 0 : index
    %c0_11 = arith.constant 0 : index
    %c0_12 = arith.constant 0 : index
    %27 = vector.load %arg5[%c0_10, %c0_11, %c0_12] : memref<3x128x128xf32, #tpu.memory_space<vmem>>, vector<1x128x128xf32>
    %28 = vector.shape_cast %27 : vector<1x128x128xf32> to vector<128x128xf32>
    %cst_13 = arith.constant dense<0.000000e+00> : vector<16x128xf32>
    %29 = tpu.matmul %26, %28, %cst_13 {dimension_numbers = #tpu.dot_dimension_numbers<[1], [0], [0], [1], [0, 0, 1, 1], [], []>} : vector<16x128xf32>, vector<128x128xf32>, vector<16x128xf32> -> vector<16x128xf32>
    %30 = vector.extract_strided_slice %24 {offsets = [1, 0], sizes = [16, 128], strides = [1, 1]} : vector<18x128xf32> to vector<16x128xf32>
    %c1 = arith.constant 1 : index
    %c0_14 = arith.constant 0 : index
    %c0_15 = arith.constant 0 : index
    %31 = vector.load %arg5[%c1, %c0_14, %c0_15] : memref<3x128x128xf32, #tpu.memory_space<vmem>>, vector<1x128x128xf32>
    %32 = vector.shape_cast %31 : vector<1x128x128xf32> to vector<128x128xf32>
    %cst_16 = arith.constant dense<0.000000e+00> : vector<16x128xf32>
    %33 = tpu.matmul %30, %32, %cst_16 {dimension_numbers = #tpu.dot_dimension_numbers<[1], [0], [0], [1], [0, 0, 1, 1], [], []>} : vector<16x128xf32>, vector<128x128xf32>, vector<16x128xf32> -> vector<16x128xf32>
    %34 = arith.addf %29, %33 : vector<16x128xf32>
    %35 = vector.extract_strided_slice %24 {offsets = [2, 0], sizes = [16, 128], strides = [1, 1]} : vector<18x128xf32> to vector<16x128xf32>
    %c2 = arith.constant 2 : index
    %c0_17 = arith.constant 0 : index
    %c0_18 = arith.constant 0 : index
    %36 = vector.load %arg5[%c2, %c0_17, %c0_18] : memref<3x128x128xf32, #tpu.memory_space<vmem>>, vector<1x128x128xf32>
    %37 = vector.shape_cast %36 : vector<1x128x128xf32> to vector<128x128xf32>
    %cst_19 = arith.constant dense<0.000000e+00> : vector<16x128xf32>
    %38 = tpu.matmul %35, %37, %cst_19 {dimension_numbers = #tpu.dot_dimension_numbers<[1], [0], [0], [1], [0, 0, 1, 1], [], []>} : vector<16x128xf32>, vector<128x128xf32>, vector<16x128xf32> -> vector<16x128xf32>
    %39 = arith.addf %34, %38 : vector<16x128xf32>
    %c0_20 = arith.constant 0 : index
    %c0_21 = arith.constant 0 : index
    %40 = vector.load %arg6[%c0_20, %c0_21] : memref<1x128xf32, #tpu.memory_space<vmem>>, vector<1x128xf32>
    %41 = vector.broadcast %40 : vector<1x128xf32> to vector<16x128xf32>
    %42 = arith.addf %39, %41 : vector<16x128xf32>
    %43 = arith.addf %42, %25 : vector<16x128xf32>
    %cst_22 = arith.constant 0.000000e+00 : f32
    %44 = vector.broadcast %cst_22 : f32 to vector<16x128xf32>
    %45 = arith.maximumf %43, %44 : vector<16x128xf32>
    %c0_23 = arith.constant 0 : index
    %c0_24 = arith.constant 0 : index
    %c0_25 = arith.constant 0 : index
    %46 = vector.load %arg7[%c0_23, %c0_24, %c0_25] : memref<1x16x128xf32, #tpu.memory_space<vmem>>, vector<1x16x128xf32>
    %47 = vector.shape_cast %46 : vector<1x16x128xf32> to vector<16x128xf32>
    %48 = vector.shape_cast %45 : vector<16x128xf32> to vector<1x16x128xf32>
    tpu.vector_store %arg7[%c0_23, %c0_24, %c0_25], %48 {strides = array<i32>} : memref<1x16x128xf32, #tpu.memory_space<vmem>>, vector<1x16x128xf32>,
    return
  }
  func.func @transform_0(%arg0: i32, %arg1: i32) -> (i32, i32, i32, i32) {
    %c0_i32 = arith.constant 0 : i32
    %c0_i32_0 = arith.constant 0 : i32
    %c0_i32_1 = arith.constant 0 : i32
    return %arg0, %arg1, %c0_i32, %c0_i32_0 : i32, i32, i32, i32
  }
  func.func @transform_1(%arg0: i32, %arg1: i32) -> (i32, i32) {
    %c0_i32 = arith.constant 0 : i32
    %c0_i32_0 = arith.constant 0 : i32
    %c0_i32_1 = arith.constant 0 : i32
    return %c0_i32, %c0_i32_0 : i32, i32
  }
  func.func @transform_2(%arg0: i32, %arg1: i32) -> (i32, i32) {
    %c0_i32 = arith.constant 0 : i32
    %c0_i32_0 = arith.constant 0 : i32
    %c0_i32_1 = arith.constant 0 : i32
    return %c0_i32, %c0_i32_0 : i32, i32
  }
  func.func @transform_3(%arg0: i32, %arg1: i32) -> (i32, i32, i32) {
    %c0_i32 = arith.constant 0 : i32
    %c0_i32_0 = arith.constant 0 : i32
    %c0_i32_1 = arith.constant 0 : i32
    %c0_i32_2 = arith.constant 0 : i32
    return %c0_i32, %c0_i32_0, %c0_i32_1 : i32, i32, i32
  }
  func.func @transform_4(%arg0: i32, %arg1: i32) -> (i32, i32) {
    %c0_i32 = arith.constant 0 : i32
    %c0_i32_0 = arith.constant 0 : i32
    %c0_i32_1 = arith.constant 0 : i32
    return %c0_i32, %c0_i32_0 : i32, i32
  }
  func.func @transform_5(%arg0: i32, %arg1: i32) -> (i32, i32, i32) {
    %c0_i32 = arith.constant 0 : i32
    %c0_i32_0 = arith.constant 0 : i32
    return %arg0, %arg1, %c0_i32 : i32, i32, i32
  }
}

</mosaic_0001>

<bundles_post_ra>
// kernel: tile.18
= control target key start
LH: loop header
LB: loop body
LE: loop exit
PB: predicated region body
PF: predicated region fallthrough
CT: control target
= control target key end

     0   :  { %s28_s0 = inlined_call_operand.vmem [shape: f32[8], index: 0, kind: input, shape index: {}]   ;;  %s29_s1 = inlined_call_operand.vmem [shape: f32[16,8], index: 1, kind: output, shape index: {}]  }
   0x1   :  { %v4_v0 = vld [vmem:[%s28_s0] ss:$0 sm:$0xff] }
   0x2   :  { %5 = vst [vmem:[%s29_s1] sm:$0xff] %v4_v0  ;;  %8 = vst [vmem:[%s29_s1 + $0x8] sm:$0xff] %v4_v0 }

// kernel: tile.19
= control target key start
LH: loop header
LB: loop body
LE: loop exit
PB: predicated region body
PF: predicated region fallthrough
CT: control target
= control target key end

     0   :  { %s133_s10 = smov 120   ;;  %s134_s11 = smov 104   ;;  %vm3_vm0 = vcmask 64512   ;;  %vm9_vm1 = vcmask 1048512   ;;  %vm15_vm2 = vcmask 982912   ;;  %vm21_vm3 = vcmask 917312   ;;  %s209_s0 = inlined_call_operand.vmem [shape: f32[16,8], index: 0, kind: input, shape index: {}]   ;;  %s210_s1 = inlined_call_operand.vmem [shape: f32[128], index: 1, kind: output, shape index: {}]  }
   0x1   :  { %v103_v0 = vld [vmem:[%s209_s0 + $0xf] sm:$0x1]   ;;  %v105_v1 = vld [vmem:[%s209_s0 + $0xd] sm:$0x1]   ;;  %v104_v2 = vld [vmem:[%s209_s0 + $0xe] sm:$0x1]  }
   0x2   :  { %7 = vrot.lane.b32.xlu0 %v103_v0, %s133_s10  ;;  %19 = vrot.lane.b32.xlu1 %v105_v1, %s134_s11  ;;  %v106_v3 = vld [vmem:[%s209_s0 + $0xc] sm:$0x1]   ;;  %s135_s16 = smov 112   ;;  %s136_s17 = smov 96   ;;  %v107_v4 = vld [vmem:[%s209_s0 + $0xb] sm:$0x1]  }
   0x3   :  { %v108_v5 = vld [vmem:[%s209_s0 + $0xa] sm:$0x1]   ;;  %v2_v6 = vld [vmem:[%s209_s0] sm:$0x1]   ;;  %s137_s24 = smov 88   ;;  %s138_s25 = smov 80  }
   0x4   :  { %4 = vst.msk [vmem:[#allocation0] sm:$0x1] %vm3_vm0, %v2_v6   ;;  %v109_v7 = vld [vmem:[%s209_s0 + $0x9] sm:$0x1]   ;;  %v110_v8 = vld [vmem:[%s209_s0 + $0x8] sm:$0x1]  }
   0x5   :  { %s139_s30 = smov 72   ;;  %s140_s2 = smov 64   ;;  %v111_v9 = vld [vmem:[%s209_s0 + $0x7] sm:$0x1]   ;;  %v112_v10 = vld [vmem:[%s209_s0 + $0x6] sm:$0x1]  }
   0x6   :  { %13 = vrot.lane.b32.xlu0 %v104_v2, %s135_s16  ;;  %25 = vrot.lane.b32.xlu1 %v106_v3, %s136_s17  ;;  %s141_s7 = smov 56   ;;  %s142_s8 = smov 48   ;;  %v113_v11 = vld [vmem:[%s209_s0 + $0x5] sm:$0x1]   ;;  %v114_v12 = vld [vmem:[%s209_s0 + $0x4] sm:$0x1]  }
   0x7   :  { %s143_s13 = smov 40   ;;  %s144_s14 = smov 32   ;;  %v115_v13 = vld [vmem:[%s209_s0 + $0x3] sm:$0x1]   ;;  %v116_v14 = vld [vmem:[%s209_s0 + $0x2] sm:$0x1]  }
   0x8   :  { %s145_s19 = smov 24   ;;  %s146_s20 = smov 16   ;;  %v117_v15 = vld [vmem:[%s209_s0 + $0x1] sm:$0x1]   ;;  %vm27_vm4 = vcmask 851712   ;;  %vm33_vm5 = vcmask 786112  }
   0x9   :  { %s147_s0 = smov 8   ;;  %vm39_vm6 = vcmask 720512   ;;  %vm45_vm7 = vcmask 654912   ;;  %vm51_vm8 = vcmask 589312   ;;  %vm57_vm9 = vcmask 523712  }
   0xa   :  { %31 = vrot.lane.b32.xlu0 %v107_v4, %s137_s24  ;;  %37 = vrot.lane.b32.xlu1 %v108_v5, %s138_s25  ;;  %vm63_vm10 = vcmask 458112   ;;  %vm69_vm11 = vcmask 392512   ;;  %vm75_vm12 = vcmask 326912   ;;  %vm81_vm13 = vcmask 261312  }
   0xb   :  { %vm87_vm14 = vcmask 195712   ;;  %vm93_vm15 = vcmask 130112  }
   0xe   :  { %43 = vrot.lane.b32.xlu0 %v109_v7, %s139_s30  ;;  %49 = vrot.lane.b32.xlu1 %v110_v8, %s140_s2 }
  0x12   :  { %55 = vrot.lane.b32.xlu0 %v111_v9, %s141_s7  ;;  %61 = vrot.lane.b32.xlu1 %v112_v10, %s142_s8 }
  0x16   :  { %67 = vrot.lane.b32.xlu0 %v113_v11, %s143_s13  ;;  %73 = vrot.lane.b32.xlu1 %v114_v12, %s144_s14 }
  0x1a   :  { %79 = vrot.lane.b32.xlu0 %v115_v13, %s145_s19  ;;  %85 = vrot.lane.b32.xlu1 %v116_v14, %s146_s20 }
  0x1e   :  { %91 = vrot.lane.b32.xlu0 %v117_v15, %s147_s0 }
  0x74   :  { %v8_v16 = vpop.permute.xlu0 %7   ;;  %v20_v17 = vpop.permute.xlu1 %19  }
  0x75   :  { %10 = vst.msk [vmem:[#allocation0] sm:$0x1] %vm9_vm1, %v8_v16  }
  0x78   :  { %v14_v18 = vpop.permute.xlu0 %13   ;;  %v26_v19 = vpop.permute.xlu1 %25  }
  0x79   :  { %16 = vst.msk [vmem:[#allocation0] sm:$0x1] %vm15_vm2, %v14_v18  }
  0x7a   :  { %22 = vst.msk [vmem:[#allocation0] sm:$0x1] %vm21_vm3, %v20_v17  }
  0x7b   :  { %28 = vst.msk [vmem:[#allocation0] sm:$0x1] %vm27_vm4, %v26_v19  }
  0x7c   :  { %v32_v20 = vpop.permute.xlu0 %31   ;;  %v38_v21 = vpop.permute.xlu1 %37  }
  0x7d   :  { %34 = vst.msk [vmem:[#allocation0] sm:$0x1] %vm33_vm5, %v32_v20  }
  0x7e   :  { %40 = vst.msk [vmem:[#allocation0] sm:$0x1] %vm39_vm6, %v38_v21  }
  0x80   :  { %v44_v22 = vpop.permute.xlu0 %43   ;;  %v50_v23 = vpop.permute.xlu1 %49  }
  0x81   :  { %46 = vst.msk [vmem:[#allocation0] sm:$0x1] %vm45_vm7, %v44_v22  }
  0x82   :  { %52 = vst.msk [vmem:[#allocation0] sm:$0x1] %vm51_vm8, %v50_v23  }
  0x84   :  { %v56_v24 = vpop.permute.xlu0 %55   ;;  %v62_v25 = vpop.permute.xlu1 %61  }
  0x85   :  { %58 = vst.msk [vmem:[#allocation0] sm:$0x1] %vm57_vm9, %v56_v24  }
  0x86   :  { %64 = vst.msk [vmem:[#allocation0] sm:$0x1] %vm63_vm10, %v62_v25  }
  0x88   :  { %v68_v26 = vpop.permute.xlu0 %67   ;;  %v74_v27 = vpop.permute.xlu1 %73  }
  0x89   :  { %70 = vst.msk [vmem:[#allocation0] sm:$0x1] %vm69_vm11, %v68_v26  }
  0x8a   :  { %76 = vst.msk [vmem:[#allocation0] sm:$0x1] %vm75_vm12, %v74_v27  }
  0x8c   :  { %v80_v28 = vpop.permute.xlu0 %79   ;;  %v86_v29 = vpop.permute.xlu1 %85  }
  0x8d   :  { %82 = vst.msk [vmem:[#allocation0] sm:$0x1] %vm81_vm13, %v80_v28  }
  0x8e   :  { %88 = vst.msk [vmem:[#allocation0] sm:$0x1] %vm87_vm14, %v86_v29  }
  0x90   :  { %v92_v30 = vpop.permute.xlu0 %91  }
  0x91   :  { %94 = vst.msk [vmem:[#allocation0] sm:$0x1] %vm93_vm15, %v92_v30  }
  0x98   :  { %v99_v31 = vld [vmem:[#allocation0] sm:$0x1] }
  0x99   :  { %102 = vst [vmem:[%s210_s1] sm:$0x1] %v99_v31 }

// kernel: tile.29
= control target key start
LH: loop header
LB: loop body
LE: loop exit
PB: predicated region body
PF: predicated region fallthrough
CT: control target
= control target key end

     0   :  { %s133_s10 = smov 120   ;;  %s134_s11 = smov 104   ;;  %vm3_vm0 = vcmask 64512   ;;  %vm9_vm1 = vcmask 1048512   ;;  %vm15_vm2 = vcmask 982912   ;;  %vm21_vm3 = vcmask 917312   ;;  %s209_s0 = inlined_call_operand.vmem [shape: f32[16,8], index: 0, kind: input, shape index: {}]   ;;  %s210_s1 = inlined_call_operand.vmem [shape: f32[1,128], index: 1, kind: output, shape index: {}]  }
   0x1   :  { %v103_v0 = vld [vmem:[%s209_s0 + $0xf] sm:$0x1]   ;;  %v105_v1 = vld [vmem:[%s209_s0 + $0xd] sm:$0x1]   ;;  %v104_v2 = vld [vmem:[%s209_s0 + $0xe] sm:$0x1]  }
   0x2   :  { %7 = vrot.lane.b32.xlu0 %v103_v0, %s133_s10  ;;  %19 = vrot.lane.b32.xlu1 %v105_v1, %s134_s11  ;;  %v106_v3 = vld [vmem:[%s209_s0 + $0xc] sm:$0x1]   ;;  %s135_s16 = smov 112   ;;  %s136_s17 = smov 96   ;;  %v107_v4 = vld [vmem:[%s209_s0 + $0xb] sm:$0x1]  }
   0x3   :  { %v108_v5 = vld [vmem:[%s209_s0 + $0xa] sm:$0x1]   ;;  %v2_v6 = vld [vmem:[%s209_s0] sm:$0x1]   ;;  %s137_s24 = smov 88   ;;  %s138_s25 = smov 80  }
   0x4   :  { %4 = vst.msk [vmem:[#allocation0] sm:$0x1] %vm3_vm0, %v2_v6   ;;  %v109_v7 = vld [vmem:[%s209_s0 + $0x9] sm:$0x1]   ;;  %v110_v8 = vld [vmem:[%s209_s0 + $0x8] sm:$0x1]  }
   0x5   :  { %s139_s30 = smov 72   ;;  %s140_s2 = smov 64   ;;  %v111_v9 = vld [vmem:[%s209_s0 + $0x7] sm:$0x1]   ;;  %v112_v10 = vld [vmem:[%s209_s0 + $0x6] sm:$0x1]  }
   0x6   :  { %13 = vrot.lane.b32.xlu0 %v104_v2, %s135_s16  ;;  %25 = vrot.lane.b32.xlu1 %v106_v3, %s136_s17  ;;  %s141_s7 = smov 56   ;;  %s142_s8 = smov 48   ;;  %v113_v11 = vld [vmem:[%s209_s0 + $0x5] sm:$0x1]   ;;  %v114_v12 = vld [vmem:[%s209_s0 + $0x4] sm:$0x1]  }
   0x7   :  { %s143_s13 = smov 40   ;;  %s144_s14 = smov 32   ;;  %v115_v13 = vld [vmem:[%s209_s0 + $0x3] sm:$0x1]   ;;  %v116_v14 = vld [vmem:[%s209_s0 + $0x2] sm:$0x1]  }
   0x8   :  { %s145_s19 = smov 24   ;;  %s146_s20 = smov 16   ;;  %v117_v15 = vld [vmem:[%s209_s0 + $0x1] sm:$0x1]   ;;  %vm27_vm4 = vcmask 851712   ;;  %vm33_vm5 = vcmask 786112  }
   0x9   :  { %s147_s0 = smov 8   ;;  %vm39_vm6 = vcmask 720512   ;;  %vm45_vm7 = vcmask 654912   ;;  %vm51_vm8 = vcmask 589312   ;;  %vm57_vm9 = vcmask 523712  }
   0xa   :  { %31 = vrot.lane.b32.xlu0 %v107_v4, %s137_s24  ;;  %37 = vrot.lane.b32.xlu1 %v108_v5, %s138_s25  ;;  %vm63_vm10 = vcmask 458112   ;;  %vm69_vm11 = vcmask 392512   ;;  %vm75_vm12 = vcmask 326912   ;;  %vm81_vm13 = vcmask 261312  }
   0xb   :  { %vm87_vm14 = vcmask 195712   ;;  %vm93_vm15 = vcmask 130112  }
   0xe   :  { %43 = vrot.lane.b32.xlu0 %v109_v7, %s139_s30  ;;  %49 = vrot.lane.b32.xlu1 %v110_v8, %s140_s2 }
  0x12   :  { %55 = vrot.lane.b32.xlu0 %v111_v9, %s141_s7  ;;  %61 = vrot.lane.b32.xlu1 %v112_v10, %s142_s8 }
  0x16   :  { %67 = vrot.lane.b32.xlu0 %v113_v11, %s143_s13  ;;  %73 = vrot.lane.b32.xlu1 %v114_v12, %s144_s14 }
  0x1a   :  { %79 = vrot.lane.b32.xlu0 %v115_v13, %s145_s19  ;;  %85 = vrot.lane.b32.xlu1 %v116_v14, %s146_s20 }
  0x1e   :  { %91 = vrot.lane.b32.xlu0 %v117_v15, %s147_s0 }
  0x74   :  { %v8_v16 = vpop.permute.xlu0 %7   ;;  %v20_v17 = vpop.permute.xlu1 %19  }
  0x75   :  { %10 = vst.msk [vmem:[#allocation0] sm:$0x1] %vm9_vm1, %v8_v16  }
  0x78   :  { %v14_v18 = vpop.permute.xlu0 %13   ;;  %v26_v19 = vpop.permute.xlu1 %25  }
  0x79   :  { %16 = vst.msk [vmem:[#allocation0] sm:$0x1] %vm15_vm2, %v14_v18  }
  0x7a   :  { %22 = vst.msk [vmem:[#allocation0] sm:$0x1] %vm21_vm3, %v20_v17  }
  0x7b   :  { %28 = vst.msk [vmem:[#allocation0] sm:$0x1] %vm27_vm4, %v26_v19  }
  0x7c   :  { %v32_v20 = vpop.permute.xlu0 %31   ;;  %v38_v21 = vpop.permute.xlu1 %37  }
  0x7d   :  { %34 = vst.msk [vmem:[#allocation0] sm:$0x1] %vm33_vm5, %v32_v20  }
  0x7e   :  { %40 = vst.msk [vmem:[#allocation0] sm:$0x1] %vm39_vm6, %v38_v21  }
  0x80   :  { %v44_v22 = vpop.permute.xlu0 %43   ;;  %v50_v23 = vpop.permute.xlu1 %49  }
  0x81   :  { %46 = vst.msk [vmem:[#allocation0] sm:$0x1] %vm45_vm7, %v44_v22  }
  0x82   :  { %52 = vst.msk [vmem:[#allocation0] sm:$0x1] %vm51_vm8, %v50_v23  }
  0x84   :  { %v56_v24 = vpop.permute.xlu0 %55   ;;  %v62_v25 = vpop.permute.xlu1 %61  }
  0x85   :  { %58 = vst.msk [vmem:[#allocation0] sm:$0x1] %vm57_vm9, %v56_v24  }
  0x86   :  { %64 = vst.msk [vmem:[#allocation0] sm:$0x1] %vm63_vm10, %v62_v25  }
  0x88   :  { %v68_v26 = vpop.permute.xlu0 %67   ;;  %v74_v27 = vpop.permute.xlu1 %73  }
  0x89   :  { %70 = vst.msk [vmem:[#allocation0] sm:$0x1] %vm69_vm11, %v68_v26  }
  0x8a   :  { %76 = vst.msk [vmem:[#allocation0] sm:$0x1] %vm75_vm12, %v74_v27  }
  0x8c   :  { %v80_v28 = vpop.permute.xlu0 %79   ;;  %v86_v29 = vpop.permute.xlu1 %85  }
  0x8d   :  { %82 = vst.msk [vmem:[#allocation0] sm:$0x1] %vm81_vm13, %v80_v28  }
  0x8e   :  { %88 = vst.msk [vmem:[#allocation0] sm:$0x1] %vm87_vm14, %v86_v29  }
  0x90   :  { %v92_v30 = vpop.permute.xlu0 %91  }
  0x91   :  { %94 = vst.msk [vmem:[#allocation0] sm:$0x1] %vm93_vm15, %v92_v30  }
  0x98   :  { %v99_v31 = vld [vmem:[#allocation0] sm:$0x1] }
  0x99   :  { %102 = vst [vmem:[%s210_s1] sm:$0x1] %v99_v31 }

// kernel: st_gcn_forward.1
= control target key start
LH: loop header
LB: loop body
LE: loop exit
PB: predicated region body
PF: predicated region fallthrough
CT: control target
= control target key end

     0   :  { %s1121_s18 = smov 0   ;;  %s1123_s19 = smov 0   ;;  %s1384_s0 = inlined_call_operand.vmem [shape: f32[2,1,18,64], index: 0, kind: input, shape index: {}]   ;;  %s1385_s1 = inlined_call_operand.vmem [shape: f32[64,256], index: 1, kind: input, shape index: {}]   ;;  %s1386_s2 = inlined_call_operand.vmem [shape: f32[1,256], index: 2, kind: input, shape index: {}]   ;;  %s1387_s3 = inlined_call_operand.vmem [shape: f32[3,128,128], index: 3, kind: input, shape index: {}]   ;;  %s1388_s4 = inlined_call_operand.vmem [shape: f32[1,128], index: 4, kind: input, shape index: {}]   ;;  %s1389_s5 = inlined_call_operand.vmem [shape: f32[2,16,128], index: 5, kind: output, shape index: {}]  }
   0x1   :  { %s1125_s20 = smov 0  }
   0x2 LB: > { %s27_s21 = sadd.s32 1, %s1084_s19  ;;  %p834_p0 = scmp.ge.s32.totalorder %s1088_s20, 1  ;;  %s1088_s20 = sphi %s1125_s20, %s15_s20   ;;  %s1084_s19 = sphi %s1123_s19, %s1391_s19   ;;  %s1080_s18 = sphi %s1121_s18, %s1390_s18  }
   0x3   : > { %p29_p1 = scmp.ge.s32.totalorder %s27_s21, 2  ;;  %p207_p2 = scmp.lt.s32.totalorder %s1088_s20, 3 }
   0x5   : > { %s1393_s21 = smov (%p29_p1, %s27_s21), 0  ;;  %p208_p3 = pnand %p834_p0, %p207_p2 }
   0x6   : > { %p243_p4 = scmp.lt.s32.totalorder (!%p208_p3), %s1080_s18, 1 }
   0x7   : > { %211 = sbr.rel (%p208_p3) target bundleno = 474 (0x1da), region = 40 }
   0xc   : > { %v280_v0 = vld [vmem:[%s1385_s1 + $0x78] sm:$0xff]  ;;  %v279_v1 = vld [vmem:[%s1385_s1 + $0x70] sm:$0xff]  ;;  %v278_v2 = vld [vmem:[%s1385_s1 + $0x68] sm:$0xff]  ;;  %v1090_v4 = vmov 0.0   ;;  %s1395_s18 = smov (!%p243_p4, %s1080_s18), 1  ;;  %vm293_vm0 = vcmask 523264   ;;  %v283_v53 = vlaneseq }
   0xd   : > { %319 = vmatprep.subr.mxu0 %v280_v0  ;;  %v277_v3 = vld [vmem:[%s1385_s1 + $0x60] sm:$0xff]  ;;  %367 = vmatprep.mubr.f32.mxu0 %v1090_v4  ;;  %v276_v5 = vld [vmem:[%s1385_s1 + $0x58] sm:$0xff]  ;;  %v275_v6 = vld [vmem:[%s1385_s1 + $0x50] sm:$0xff]  ;;  %s1040_s23 = smul.u32 24, %s1395_s18  ;;  %vm455_vm2 = vcmask 1046528   ;;  %vm630_vm4 = vcmask 1045504  }
   0xe   : > { %320 = vmatpush1.msra.mxu0 %v279_v1  ;;  %v274_v7 = vld [vmem:[%s1385_s1 + $0x48] sm:$0xff]  ;;  %v273_v8 = vld [vmem:[%s1385_s1 + $0x40] sm:$0xff]  ;;  %v272_v9 = vld [vmem:[%s1385_s1 + $0x38] sm:$0xff]  ;;  %v284_v54 = vshrl.u32 %v283_v53, 7  ;;  %s880_s7 = sshll.u32 %s1395_s18, 4 }
   0xf   : > { %321 = vmatprep.subr.mxu0 %v278_v2  ;;  %v859_v10 = vld [vmem:[%s1387_s3 + $0xf8] sm:$0xff]  ;;  %v271_v11 = vld [vmem:[%s1385_s1 + $0x30] sm:$0xff]  ;;  %v270_v12 = vld [vmem:[%s1385_s1 + $0x28] sm:$0xff]  ;;  %s1200_s15 = scalar_lea.vmem %s1384_s0, %s1040_s23  ;;  %s260_s10 = scalar_lea.vmem %s1389_s5, %s880_s7 }
  0x10   : > { %322 = vmatpush1.msra.mxu0 %v277_v3  ;;  %935 = vmatprep.subr.mxu1 %v859_v10  ;;  %v858_v13 = vld [vmem:[%s1387_s3 + $0xf0] sm:$0xff]  ;;  %v269_v14 = vld [vmem:[%s1385_s1 + $0x20] sm:$0xff]  ;;  %v857_v15 = vld [vmem:[%s1387_s3 + $0xe8] sm:$0xff]  ;;  %v285_v55 = vsub.s32 0, %v284_v54  ;;  %v841_v58 = vadd.s32 4294967295, %v284_v54  ;;  %v289_v59 = vsub.s32 1, %v284_v54 }
  0x11   : > { %323 = vmatprep.subr.mxu0 %v276_v5  ;;  %936 = vmatpush3.msra.mxu1 %v859_v10  ;;  %v268_v16 = vld [vmem:[%s1385_s1 + $0x18] sm:$0xff]  ;;  %v856_v17 = vld [vmem:[%s1387_s3 + $0xe0] sm:$0xff]  ;;  %v267_v18 = vld [vmem:[%s1385_s1 + $0x10] sm:$0xff]  ;;  %v392_v0 = vadd.s32 16, %v284_v54 }
  0x12   : > { %324 = vmatpush1.msra.mxu0 %v275_v6  ;;  %937 = vmatprep.subr.mxu1 %v858_v13  ;;  %v266_v19 = vld [vmem:[%s1385_s1 + $0x8] sm:$0xff]  ;;  %v855_v20 = vld [vmem:[%s1387_s3 + $0xd8] sm:$0xff]  ;;  %v265_v21 = vld [vmem:[%s1385_s1] sm:$0xff]  ;;  %vm401_vm1 = vcmp.ge.s32.totalorder %v841_v58, 0 }
  0x13   : > { %325 = vmatprep.subr.mxu0 %v274_v7  ;;  %938 = vmatpush3.msra.mxu1 %v858_v13  ;;  %v262_v22 = vld [vmem:[%s1200_s15] sm:$0xff]  ;;  %v434_v23 = vld [vmem:[%s1387_s3 + $0x78] sm:$0xff]  ;;  %v433_v24 = vld [vmem:[%s1387_s3 + $0x70] sm:$0xff]  ;;  %v843_v7 = vadd.s32 4294967295, %v392_v0 }
  0x14   : > { %326 = vmatpush1.msra.mxu0 %v273_v8  ;;  %939 = vmatprep.subr.mxu1 %v857_v15  ;;  %v854_v25 = vld [vmem:[%s1387_s3 + $0xd0] sm:$0xff]  ;;  %v263_v26 = vld [vmem:[%s1200_s15 + $0x8] sm:$0xff]  ;;  %v431_v28 = vld [vmem:[%s1387_s3 + $0x60] sm:$0xff] }
  0x15   : > { %327 = vmatprep.subr.mxu0 %v272_v9  ;;  %940 = vmatpush3.msra.mxu1 %v857_v15  ;;  %v432_v27 = vld [vmem:[%s1387_s3 + $0x68] sm:$0xff]  ;;  %v264_v30 = vld [vmem:[%s1200_s15 + $0x10] sm:$0x3]  ;;  %v430_v31 = vld [vmem:[%s1387_s3 + $0x58] sm:$0xff]  ;;  %vm406_vm3 = vcmp.lt.s32.totalorder %v843_v7, 16 }
  0x16   : > { %328 = vmatpush1.msra.mxu0 %v271_v11  ;;  %941 = vmatprep.subr.mxu1 %v856_v17  ;;  %v853_v29 = vld [vmem:[%s1387_s3 + $0xc8] sm:$0xff]  ;;  %v852_v32 = vld [vmem:[%s1387_s3 + $0xc0] sm:$0xff]  ;;  %v429_v33 = vld [vmem:[%s1387_s3 + $0x50] sm:$0xff] }
  0x17   : > { %329 = vmatprep.subr.mxu0 %v270_v12  ;;  %942 = vmatpush3.msra.mxu1 %v856_v17  ;;  %v428_v34 = vld [vmem:[%s1387_s3 + $0x48] sm:$0xff]  ;;  %v427_v35 = vld [vmem:[%s1387_s3 + $0x40] sm:$0xff]  ;;  %v426_v36 = vld [vmem:[%s1387_s3 + $0x38] sm:$0xff] }
  0x18   : > { %330 = vmatpush1.msra.mxu0 %v269_v14  ;;  %943 = vmatprep.subr.mxu1 %v855_v20  ;;  %v425_v37 = vld [vmem:[%s1387_s3 + $0x30] sm:$0xff]  ;;  %v424_v38 = vld [vmem:[%s1387_s3 + $0x28] sm:$0xff]  ;;  %v423_v39 = vld [vmem:[%s1387_s3 + $0x20] sm:$0xff] }
  0x19   : > { %331 = vmatprep.subr.mxu0 %v268_v16  ;;  %944 = vmatpush3.msra.mxu1 %v855_v20  ;;  %v851_v40 = vld [vmem:[%s1387_s3 + $0xb8] sm:$0xff]  ;;  %v850_v42 = vld [vmem:[%s1387_s3 + $0xb0] sm:$0xff]  ;;  %v849_v44 = vld [vmem:[%s1387_s3 + $0xa8] sm:$0xff] }
  0x1a   : > { %332 = vmatpush1.msra.mxu0 %v267_v18  ;;  %945 = vmatprep.subr.mxu1 %v854_v25  ;;  %v422_v41 = vld [vmem:[%s1387_s3 + $0x18] sm:$0xff]  ;;  %v421_v43 = vld [vmem:[%s1387_s3 + $0x10] sm:$0xff]  ;;  %v420_v45 = vld [vmem:[%s1387_s3 + $0x8] sm:$0xff] }
  0x1b   : > { %333 = vmatprep.subr.mxu0 %v266_v19  ;;  %946 = vmatpush3.msra.mxu1 %v854_v25  ;;  %v848_v46 = vld [vmem:[%s1387_s3 + $0xa0] sm:$0xff]  ;;  %v847_v48 = vld [vmem:[%s1387_s3 + $0x98] sm:$0xff]  ;;  %v846_v49 = vld [vmem:[%s1387_s3 + $0x90] sm:$0xff] }
  0x1c   : > { %334 = vmatpush1.msra.mxu0 %v265_v21  ;;  %947 = vmatprep.subr.mxu1 %v853_v29  ;;  %v419_v47 = vld [vmem:[%s1387_s3] sm:$0xff]  ;;  %v845_v50 = vld [vmem:[%s1387_s3 + $0x88] sm:$0xff]  ;;  %v876_v52 = vld [vmem:[%s1387_s3 + $0x178] sm:$0xff] }
  0x1d   : > { %838 = vmatmul.mubr.msk.f32.vlgmr.msra.gmra.mxu0 %vm293_vm0, %v262_v22  ;;  %970 = vmatprep.subr.mxu0 %v434_v23  ;;  %v844_v51 = vld [vmem:[%s1387_s3 + $0x80] sm:$0xff] }
  0x1e   : > { %373 = vmatprep.mubr.f32.mxu0 %v1090_v4  ;;  %971 = vmatpush3.msra.mxu0 %v434_v23  ;;  %v281_v56 = vld [vmem:[%s1386_s2] sm:$0x3] }
  0x1f   : > { %972 = vmatprep.subr.mxu0 %v433_v24  ;;  %948 = vmatpush3.msra.mxu1 %v853_v29  ;;  %v286_v57 = vrot.slane %v281_v56, %v285_v55  ;;  %v290_v62 = vrot.slane %v281_v56, %v289_v59 }
  0x20   : > { %973 = vmatpush3.msra.mxu0 %v433_v24  ;;  %949 = vmatprep.subr.mxu1 %v852_v32 }
  0x21   : > { %839 = vmatmul.mubr.msk.f32.gmra.mxu0 %vm293_vm0, %v263_v26  ;;  %974 = vmatprep.subr.mxu0 %v432_v27 }
  0x22   : > { %379 = vmatprep.mubr.f32.mxu0 %v1090_v4  ;;  %975 = vmatpush3.msra.mxu0 %v432_v27 }
  0x23   : > { %976 = vmatprep.subr.mxu0 %v431_v28  ;;  %950 = vmatpush3.msra.mxu1 %v852_v32  ;;  %v872_v32 = vld [vmem:[%s1387_s3 + $0x158] sm:$0xff] }
  0x24   : > { %977 = vmatpush3.msra.mxu0 %v431_v28  ;;  %951 = vmatprep.subr.mxu1 %v851_v40  ;;  %v875_v28 = vld [vmem:[%s1387_s3 + $0x170] sm:$0xff] }
  0x25   : > { %840 = vmatmul.mubr.msk.f32.gmra.mxu0 %vm293_vm0, %v264_v30  ;;  %978 = vmatprep.subr.mxu0 %v430_v31  ;;  %v874_v30 = vld [vmem:[%s1387_s3 + $0x168] sm:$0xff] }
  0x26   : > { %979 = vmatpush3.msra.mxu0 %v430_v31  ;;  %952 = vmatpush3.msra.mxu1 %v851_v40  ;;  %v873_v31 = vld [vmem:[%s1387_s3 + $0x160] sm:$0xff]  ;;  %v864_v40 = vld [vmem:[%s1387_s3 + $0x118] sm:$0xff] }
  0x27   : > { %980 = vmatprep.subr.mxu0 %v429_v33  ;;  %953 = vmatprep.subr.mxu1 %v850_v42 }
  0x28   : > { %981 = vmatpush3.msra.mxu0 %v429_v33  ;;  %954 = vmatpush3.msra.mxu1 %v850_v42  ;;  %v871_v33 = vld [vmem:[%s1387_s3 + $0x150] sm:$0xff]  ;;  %v862_v42 = vld [vmem:[%s1387_s3 + $0x108] sm:$0xff] }
  0x29   : > { %982 = vmatprep.subr.mxu0 %v428_v34  ;;  %955 = vmatprep.subr.mxu1 %v849_v44 }
  0x2a   : > { %983 = vmatpush3.msra.mxu0 %v428_v34  ;;  %956 = vmatpush3.msra.mxu1 %v849_v44  ;;  %v870_v34 = vld [vmem:[%s1387_s3 + $0x148] sm:$0xff]  ;;  %v861_v44 = vld [vmem:[%s1387_s3 + $0x100] sm:$0xff] }
  0x2b   : > { %984 = vmatprep.subr.mxu0 %v427_v35  ;;  %957 = vmatprep.subr.mxu1 %v848_v46 }
  0x2c   : > { %985 = vmatpush3.msra.mxu0 %v427_v35  ;;  %958 = vmatpush3.msra.mxu1 %v848_v46  ;;  %v869_v35 = vld [vmem:[%s1387_s3 + $0x140] sm:$0xff] }
  0x2d   : > { %986 = vmatprep.subr.mxu0 %v426_v36  ;;  %959 = vmatprep.subr.mxu1 %v847_v48 }
  0x2e   : > { %987 = vmatpush3.msra.mxu0 %v426_v36  ;;  %960 = vmatpush3.msra.mxu1 %v847_v48  ;;  %v868_v36 = vld [vmem:[%s1387_s3 + $0x138] sm:$0xff] }
  0x2f   : > { %988 = vmatprep.subr.mxu0 %v425_v37  ;;  %961 = vmatprep.subr.mxu1 %v846_v49 }
  0x30   : > { %989 = vmatpush3.msra.mxu0 %v425_v37  ;;  %962 = vmatpush3.msra.mxu1 %v846_v49  ;;  %v867_v37 = vld [vmem:[%s1387_s3 + $0x130] sm:$0xff] }
  0x31   : > { %990 = vmatprep.subr.mxu0 %v424_v38  ;;  %963 = vmatprep.subr.mxu1 %v845_v50 }
  0x32   : > { %991 = vmatpush3.msra.mxu0 %v424_v38  ;;  %964 = vmatpush3.msra.mxu1 %v845_v50  ;;  %v866_v38 = vld [vmem:[%s1387_s3 + $0x128] sm:$0xff] }
  0x33   : > { %992 = vmatprep.subr.mxu0 %v423_v39  ;;  %965 = vmatprep.subr.mxu1 %v844_v51 }
  0x34   : > { %993 = vmatpush3.msra.mxu0 %v423_v39  ;;  %966 = vmatpush3.msra.mxu1 %v844_v51  ;;  %v865_v39 = vld [vmem:[%s1387_s3 + $0x120] sm:$0xff] }
  0x35   : > { %994 = vmatprep.subr.mxu0 %v422_v41  ;;  %1005 = vmatprep.subr.mxu1 %v876_v52 }
  0x36   : > { %995 = vmatpush3.msra.mxu0 %v422_v41  ;;  %v863_v41 = vld [vmem:[%s1387_s3 + $0x110] sm:$0xff] }
  0x37   : > { %996 = vmatprep.subr.mxu0 %v421_v43 }
  0x38   : > { %997 = vmatpush3.msra.mxu0 %v421_v43 }
  0x39   : > { %998 = vmatprep.subr.mxu0 %v420_v45 }
  0x3a   : > { %999 = vmatpush3.msra.mxu0 %v420_v45 }
  0x3b   : > { %1000 = vmatprep.subr.mxu0 %v419_v47 }
  0x3c   : > { %1001 = vmatpush3.msra.mxu0 %v419_v47 }
  0xdd   : > { %v369_v60 = vpop.f32.mrf.mxu0 }
  0xde   : > { %v370_v61 = vadd.f32 %v369_v60, %v286_v57 }
  0xdf   : > { %v371_v63 = vpop.f32.mrf.mxu0 }
  0xe0   : > { %v386_v1 = vmax.f32 %v370_v61, 0.0  ;;  %v372_v5 = vadd.f32 %v371_v63, %v290_v62 }
  0xe1   : > { %v375_v2 = vpop.f32.mrf.mxu0 }
  0xe2   : > { %v376_v3 = vadd.f32 %v375_v2, %v286_v57  ;;  %1002 = vmatprep.mubr.msk.f32.mxu0 %vm401_vm1, %v386_v1  ;;  %v416_v4 = vsel %vm401_vm1, %v386_v1, 0.0  ;;  %v727_v15 = vrot.slane %v372_v5, 1 }
  0xe3   : > { %v377_v6 = vpop.f32.mrf.mxu0  ;;  %v456_v11 = vrot.slane %v416_v4, 1  ;;  %v631_v25 = vrot.slane %v416_v4, 2 }
  0xe4   : > { %v1306_v8 = vmax.f32 %v376_v3, 0.0  ;;  %v378_v9 = vadd.f32 %v377_v6, %v290_v62 }
  0xe5   : > { %v381_v10 = vpop.f32.mrf.mxu0 }
  0xe6   : > { %v728_v12 = vrot.slane %v378_v9, 1  ;;  %v382_v13 = vadd.f32 %v381_v10, %v286_v57  ;;  %1003 = vmatmul.mubr.f32.vlgmr.msra.gmra.mxu0 %v1306_v8  ;;  %v457_v14 = vrot.slane %v1306_v8, 1  ;;  %v632_v21 = vrot.slane %v1306_v8, 2 }
  0xe7   : > { %v383_v16 = vpop.f32.mrf.mxu0 }
  0xe8   : > { %v388_v17 = vmax.f32 %v382_v13, 0.0  ;;  %v384_v18 = vadd.f32 %v383_v16, %v290_v62  ;;  %v458_v19 = vsel %vm455_vm2, %v456_v11, %v457_v14  ;;  %v1312_v20 = vsel %vm455_vm2, %v727_v15, %v728_v12 }
  0xe9   : > { %967 = vmatprep.mubr.f32.mxu1 %v458_v19  ;;  %v633_v29 = vsel %vm630_vm4, %v631_v25, %v632_v21 }
  0xea   : > { %v418_v22 = vsel %vm406_vm3, %v388_v17, 0.0  ;;  %v730_v23 = vrot.slane %v384_v18, 1 }
  0xeb   : > { %v459_v24 = vrot.slane %v418_v22, 1  ;;  %v634_v43 = vrot.slane %v418_v22, 2 }
  0xec   : > { %v1316_v26 = vsel %vm455_vm2, %v728_v12, %v730_v23 }
  0xed   : > { %v460_v27 = vsel %vm455_vm2, %v457_v14, %v459_v24  ;;  %v635_v45 = vsel %vm630_vm4, %v632_v21, %v634_v43 }
  0xee   : > { %968 = vmatmul.mubr.f32.vlgmr.msra.gmra.mxu1 %v460_v27 }
  0xef   : > { %1006 = vmatpush3.msra.mxu1 %v876_v52  ;;  %1037 = vmatprep.mubr.f32.mxu1 %v633_v29  ;;  %v877_v52 = vld [vmem:[%s1388_s4] ss:$0 sm:$0xff] }
  0xf0   : > { %1007 = vmatprep.subr.mxu1 %v875_v28 }
  0xf1   : > { %1008 = vmatpush3.msra.mxu1 %v875_v28 }
  0xf2   : > { %1009 = vmatprep.subr.mxu1 %v874_v30 }
  0xf3   : > { %1010 = vmatpush3.msra.mxu1 %v874_v30 }
  0xf4   : > { %1011 = vmatprep.subr.mxu1 %v873_v31 }
  0xf5   : > { %1012 = vmatpush3.msra.mxu1 %v873_v31 }
  0xf6   : > { %1013 = vmatprep.subr.mxu1 %v872_v32 }
  0xf7   : > { %1014 = vmatpush3.msra.mxu1 %v872_v32 }
  0xf8   : > { %1015 = vmatprep.subr.mxu1 %v871_v33 }
  0xf9   : > { %1016 = vmatpush3.msra.mxu1 %v871_v33 }
  0xfa   : > { %1017 = vmatprep.subr.mxu1 %v870_v34 }
  0xfb   : > { %1018 = vmatpush3.msra.mxu1 %v870_v34 }
  0xfc   : > { %1019 = vmatprep.subr.mxu1 %v869_v35 }
  0xfd   : > { %1020 = vmatpush3.msra.mxu1 %v869_v35 }
  0xfe   : > { %1021 = vmatprep.subr.mxu1 %v868_v36 }
  0xff   : > { %1022 = vmatpush3.msra.mxu1 %v868_v36 }
 0x100   : > { %1023 = vmatprep.subr.mxu1 %v867_v37 }
 0x101   : > { %1024 = vmatpush3.msra.mxu1 %v867_v37 }
 0x102   : > { %1025 = vmatprep.subr.mxu1 %v866_v38 }
 0x103   : > { %1026 = vmatpush3.msra.mxu1 %v866_v38 }
 0x104   : > { %1027 = vmatprep.subr.mxu1 %v865_v39 }
 0x105   : > { %1028 = vmatpush3.msra.mxu1 %v865_v39 }
 0x106   : > { %1029 = vmatprep.subr.mxu1 %v864_v40 }
 0x107   : > { %1030 = vmatpush3.msra.mxu1 %v864_v40 }
 0x108   : > { %1031 = vmatprep.subr.mxu1 %v863_v41 }
 0x109   : > { %1032 = vmatpush3.msra.mxu1 %v863_v41 }
 0x10a   : > { %1033 = vmatprep.subr.mxu1 %v862_v42 }
 0x10b   : > { %1034 = vmatpush3.msra.mxu1 %v862_v42 }
 0x10c   : > { %1035 = vmatprep.subr.mxu1 %v861_v44 }
 0x10d   : > { %1036 = vmatpush3.msra.mxu1 %v861_v44 }
 0x10e   : > { %1038 = vmatmul.mubr.f32.vlgmr.msra.gmra.mxu1 %v635_v45 }
 0x1a6   : > { %v1004_v47 = vpop.f32.mrf.mxu0 }
 0x1a8   : > { %v604_v50 = vpop.f32.mrf.mxu0 }
 0x1ae   : > { %v969_v46 = vpop.f32.mrf.mxu1 }
 0x1af   : > { %v610_v49 = vadd.f32 %v1004_v47, %v969_v46 }
 0x1b0   : > { %v529_v48 = vpop.f32.mrf.mxu1 }
 0x1b1   : > { %v605_v53 = vadd.f32 %v604_v50, %v529_v48 }
 0x1ce   : > { %v1039_v51 = vpop.f32.mrf.mxu1 }
 0x1cf   : > { %v714_v54 = vadd.f32 %v1039_v51, %v610_v49 }
 0x1d0   : > { %v704_v55 = vpop.f32.mrf.mxu1 }
 0x1d1   : > { %v723_v56 = vadd.f32 %v877_v52, %v714_v54  ;;  %v713_v57 = vadd.f32 %v704_v55, %v605_v53 }
 0x1d3   : > { %v735_v58 = vadd.f32 %v1316_v26, %v723_v56  ;;  %v722_v59 = vadd.f32 %v877_v52, %v713_v57 }
 0x1d5   : > { %v737_v60 = vmax.f32 %v735_v58, 0.0  ;;  %v734_v61 = vadd.f32 %v1312_v20, %v722_v59 }
 0x1d7   : > { %739 = vst [vmem:[%s260_s10 + $0x8] sm:$0xff] %v737_v60  ;;  %v736_v62 = vmax.f32 %v734_v61, 0.0 }
 0x1d9   : > { %738 = vst [vmem:[%s260_s10] sm:$0xff] %v736_v62 }
 0x1da PF: > { %s15_s20 = sadd.s32 1, %s1088_s20   ;;  %s1390_s18 = smov %s1084_s19 }
 0x1db   : > { %p12_p5 = scmp.ge.s32.totalorder %s15_s20, 4   ;;  %s1391_s19 = smov %s1393_s21 }
 0x1dd   :  { %14 = sbr.rel (!%p12_p5) target bundleno = 2 (0x2), region = 72 }

</bundles_post_ra>
